<compile_context>
chip_gen: v5e
topology: v5e:2x2
jax: 0.10.0
libtpu: 0.0.40
codegen_flags: <defaults>
</compile_context>

<pallas_src>
import jax
import jax.numpy as jnp
from jax.experimental import pallas as pl
from jax.experimental.pallas import tpu as pltpu


C_PAD = 128      # lane-dense channel width (all channel dims padded to this)
ROW_ALIGN = 16   # bf16 native sublane tile is (16, 128)


def _round_up(n, m):
    return ((n + m - 1) // m) * m


def _pad2(x, rows, cols):
    r, c = x.shape
    return jnp.pad(x, ((0, rows - r), (0, cols - c)))


# ---------------------------------------------------------------------------
# Fused forward kernel: all SAGEConv layers + log_softmax in one pallas_call.
# ---------------------------------------------------------------------------

def _make_fused_kernel(t_pads, s_pads, out_channels, num_layers):
    """Builds kernel(a_0..a_{L-1}, rdeg_0..rdeg_{L-1}, x0,
                     wcat_0..wcat_{L-1}, b_0..b_{L-1}, o_ref, cat0, cat1).
    All shapes are static Python ints so the layer loop unrolls at trace time."""
    L = num_layers

    def kernel(*refs):
        a_refs = refs[0:L]                      # bf16 (t_pad_i, s_pad_i), exact 0/1
        r_refs = refs[L:2 * L]                  # f32  (t_pad_i, 1) reciprocal degree
        x0_ref = refs[2 * L]                    # bf16 (s_pad_0, C_PAD)
        w_refs = refs[2 * L + 1:3 * L + 1]      # bf16 (2*C_PAD, C_PAD) = [[W_l],[W_r]]
        b_refs = refs[3 * L + 1:4 * L + 1]      # f32  (1, C_PAD)
        o_ref = refs[4 * L + 1]                 # f32  (t_pad_last, C_PAD)
        cat_refs = refs[4 * L + 2:4 * L + 4]    # 2x bf16 (n_scratch, 2*C_PAD) ping-pong

        for i in range(L):
            t_pad, s_pad = t_pads[i], s_pads[i]
            cat = cat_refs[i % 2]

            if i == 0:
                x_src = x0_ref[...]                       # (s_pad_0, C_PAD)
                # Lay out the root half of hop 0's cat buffer (one small copy; later
                # layers get this half written directly by the previous layer).
                cat[:t_pad, C_PAD:] = x_src[:t_pad, :]
            else:
                # Root/source activations were stored here by layer i-1 (lane slice is
                # 128-aligned, sublane slice 16-aligned -> plain dense loads).
                x_src = cat[:s_pad, C_PAD:]

            # Neighbor sum on the MXU (A is exact 0/1), f32 accumulate, then exact
            # f32 mean via reciprocal degree (VPU multiply).
            agg = jnp.dot(a_refs[i][...], x_src, preferred_element_type=jnp.float32)
            agg = agg * r_refs[i][...]
            cat[:t_pad, :C_PAD] = agg.astype(jnp.bfloat16)

            # Fused neighbor+root transform over the pre-laid-out cat buffer:
            #   [agg | x_root] @ [[W_l],[W_r]]   (K = 2*C_PAD = 256)
            out = jnp.dot(cat[:t_pad, :], w_refs[i][...],
                          preferred_element_type=jnp.float32)
            out = out + b_refs[i][...]                    # (1, C_PAD) broadcast

            if i != L - 1:
                out = jnp.maximum(out, 0.0)   # ReLU; dropout(p=0.5) eval => identity
                # Store into the root half of the NEXT layer's cat buffer.
                cat_refs[(i + 1) % 2][:t_pad, C_PAD:] = out.astype(jnp.bfloat16)
            else:
                # Fused log_softmax epilogue; mask the zero-padded class lanes.
                col = jax.lax.broadcasted_iota(jnp.int32, out.shape, 1)
                valid = col < out_channels
                logits = jnp.where(valid, out, -jnp.inf)
                m = jnp.max(logits, axis=-1, keepdims=True)
                s = logits - m
                lse = jnp.log(jnp.sum(jnp.where(valid, jnp.exp(s), 0.0),
                                      axis=-1, keepdims=True))
                o_ref[...] = jnp.where(valid, s - lse, 0.0).astype(o_ref.dtype)

    return kernel


# ---------------------------------------------------------------------------
# Wrapper: pad to lane/sublane-dense shapes, concat weights, single pallas_call.
# ---------------------------------------------------------------------------

def sage_forward(x, adjs01, degs, params, out_channels):
    """x: (n_src_0, in_channels) features of the outermost sampled hop.
       adjs01[i]: exact 0/1 bipartite adjacency (n_tgt_i, n_src_i) of hop i (no self edge).
       degs[i]:   (n_tgt_i, 1) f32 neighbor counts (row sums of adjs01[i]).
       params[i] = (W_l, W_r, b) of SAGEConv layer i."""
    num_layers = len(params)
    n_srcs = [a.shape[1] for a in adjs01]
    n_tgts = [a.shape[0] for a in adjs01]
    for i in range(1, num_layers):
        # NeighborSampler invariant: layer i's sources are layer i-1's targets.
        assert n_srcs[i] == n_tgts[i - 1]

    s_pads = tuple(_round_up(n, ROW_ALIGN) for n in n_srcs)
    t_pads = tuple(_round_up(n, ROW_ALIGN) for n in n_tgts)

    # Inputs: bf16 MXU operands, zero-padded to lane/sublane-dense shapes.
    x_p = _pad2(x, s_pads[0], C_PAD).astype(jnp.bfloat16)

    a_list, r_list, w_list, b_list = [], [], [], []
    for i in range(num_layers):
        a_list.append(_pad2(adjs01[i], t_pads[i], s_pads[i]).astype(jnp.bfloat16))
        recip = 1.0 / jnp.maximum(degs[i], 1.0)
        r_list.append(_pad2(recip, t_pads[i], 1).astype(jnp.float32))
        w_l, w_r, b = params[i]
        wl_p = _pad2(w_l, C_PAD, C_PAD)
        wr_p = _pad2(w_r, C_PAD, C_PAD)
        w_list.append(jnp.concatenate([wl_p, wr_p], axis=0).astype(jnp.bfloat16))
        b_list.append(_pad2(b, 1, C_PAD).astype(jnp.float32))

    kernel = _make_fused_kernel(t_pads, s_pads, out_channels, num_layers)
    vmem_spec = pl.BlockSpec(memory_space=pltpu.MemorySpace.VMEM)
    n_scratch = max(t_pads)  # already a multiple of ROW_ALIGN

    out_pad = pl.pallas_call(
        kernel,
        out_shape=jax.ShapeDtypeStruct((t_pads[-1], C_PAD), jnp.float32),
        in_specs=[vmem_spec] * (4 * num_layers + 1),
        out_specs=vmem_spec,
        scratch_shapes=[
            pltpu.VMEM((n_scratch, 2 * C_PAD), jnp.bfloat16),   # cat ping
            pltpu.VMEM((n_scratch, 2 * C_PAD), jnp.bfloat16),   # cat pong
        ],
        compiler_params=pltpu.CompilerParams(
            vmem_limit_bytes=32 * 1024 * 1024),
    )(*a_list, *r_list, x_p, *w_list, *b_list)

    return out_pad[:n_tgts[-1], :out_channels]


# ---------------------------------------------------------------------------
# Pure-JAX f32 reference (mirrors PyG SAGEConv: mean over sampled neighbors,
# root through W_r, ReLU between layers, final log_softmax).
# ---------------------------------------------------------------------------

def sage_reference(x, adjs01, degs, params):
    h = x
    num_layers = len(params)
    for i, ((w_l, w_r, b), a, d) in enumerate(zip(params, adjs01, degs)):
        n_tgt = a.shape[0]
        h_tgt = h[:n_tgt]
        agg = (a @ h) / jnp.maximum(d, 1.0)
        out = agg @ w_l + h_tgt @ w_r + b
        if i != num_layers - 1:
            out = jax.nn.relu(out)
        h = out
    return jax.nn.log_softmax(h, axis=-1)


# ---------------------------------------------------------------------------
# Deterministic synthetic setup (NeighborSampler-style bipartite hops).
# ---------------------------------------------------------------------------

def build_sampled_adj(key, n_src, n_tgt, k):
    """Exact 0/1 bipartite adjacency: each target gets k sampled source neighbors
    (no self edge — the root node goes through W_r only, as in default SAGEConv).
    Returns (adjacency, degree) with degree = row sums (unique sampled neighbors)."""
    src = jax.random.randint(key, (n_tgt, k), 0, n_src)
    a = jnp.zeros((n_tgt, n_src), jnp.float32)
    rows = jnp.broadcast_to(jnp.arange(n_tgt)[:, None], (n_tgt, k))
    a = a.at[rows.reshape(-1), src.reshape(-1)].set(1.0)
    deg = jnp.sum(a, axis=1, keepdims=True)
    return a, deg


def init_params(key, dims):
    """dims = [in_channels, hidden, ..., hidden, out_channels]."""
    params = []
    for i in range(len(dims) - 1):
        c_in, c_out = dims[i], dims[i + 1]
        k1, k2, key = jax.random.split(key, 3)
        scale = 1.0 / jnp.sqrt(jnp.float32(c_in))
        w_l = scale * jax.random.normal(k1, (c_in, c_out), jnp.float32)
        w_r = scale * jax.random.normal(k2, (c_in, c_out), jnp.float32)
        b = jnp.zeros((1, c_out), jnp.float32)
        params.append((w_l, w_r, b))
    return params


if __name__ == "__main__":
    key = jax.random.PRNGKey(0)

    in_channels, hidden_channels, out_channels, num_layers = 16, 32, 8, 3
    # Sampled node counts per hop (outermost sources -> final target batch).
    layer_nodes = [64, 32, 16, 8]

    k_x, k_adj, k_p = jax.random.split(key, 3)
    x = jax.random.normal(k_x, (layer_nodes[0], in_channels), jnp.float32)

    adj_keys = jax.random.split(k_adj, num_layers)
    adjs01, degs = [], []
    for i in range(num_layers):
        a, d = build_sampled_adj(adj_keys[i], layer_nodes[i], layer_nodes[i + 1], k=4)
        adjs01.append(a)
        degs.append(d)

    params = init_params(
        k_p, [in_channels, hidden_channels, hidden_channels, out_channels])

    out = sage_forward(x, adjs01, degs, params, out_channels)
    jax.block_until_ready(out)

    assert out.shape == (layer_nodes[-1], out_channels)
    # Rows of log_softmax must exp-sum to 1.
    row_sums = jnp.sum(jnp.exp(out), axis=-1)
    assert bool(jnp.all(jnp.abs(row_sums - 1.0) < 1e-4))
    # Parity with the f32 reference (bf16 weights/activations -> loose tolerance).
    ref = sage_reference(x, adjs01, degs, params)
    assert bool(jnp.max(jnp.abs(out - ref)) < 0.25)

    print("KERNEL_OK")
</pallas_src>

<mosaic_0001>
module attributes {stable_mosaic.version = 11 : i64} {
  func.func @kernel(%arg0: memref<32x64xbf16, #tpu.memory_space<vmem>>, %arg1: memref<16x32xbf16, #tpu.memory_space<vmem>>, %arg2: memref<16x16xbf16, #tpu.memory_space<vmem>>, %arg3: memref<32x1xf32, #tpu.memory_space<vmem>>, %arg4: memref<16x1xf32, #tpu.memory_space<vmem>>, %arg5: memref<16x1xf32, #tpu.memory_space<vmem>>, %arg6: memref<64x128xbf16, #tpu.memory_space<vmem>>, %arg7: memref<256x128xbf16, #tpu.memory_space<vmem>>, %arg8: memref<256x128xbf16, #tpu.memory_space<vmem>>, %arg9: memref<256x128xbf16, #tpu.memory_space<vmem>>, %arg10: memref<1x128xf32, #tpu.memory_space<vmem>>, %arg11: memref<1x128xf32, #tpu.memory_space<vmem>>, %arg12: memref<1x128xf32, #tpu.memory_space<vmem>>, %arg13: memref<16x128xf32, #tpu.memory_space<vmem>>, %arg14: memref<32x256xbf16, #tpu.memory_space<vmem>>, %arg15: memref<32x256xbf16, #tpu.memory_space<vmem>>) attributes {dimension_semantics = [], scalar_prefetch = 0 : i64, scratch_operands = 2 : i64, tpu.core_type = #tpu.core_type<tc>} {
    %c0 = arith.constant 0 : index
    %c0_0 = arith.constant 0 : index
    %0 = vector.load %arg6[%c0, %c0_0] : memref<64x128xbf16, #tpu.memory_space<vmem>>, vector<64x128xbf16>
    %1 = vector.extract_strided_slice %0 {offsets = [0, 0], sizes = [32, 128], strides = [1, 1]} : vector<64x128xbf16> to vector<32x128xbf16>
    %c0_1 = arith.constant 0 : index
    %c128 = arith.constant 128 : index
    %2 = vector.load %arg14[%c0_1, %c128] : memref<32x256xbf16, #tpu.memory_space<vmem>>, vector<32x128xbf16>
    tpu.vector_store %arg14[%c0_1, %c128], %1 {strides = array<i32>} : memref<32x256xbf16, #tpu.memory_space<vmem>>, vector<32x128xbf16>,
    %c0_2 = arith.constant 0 : index
    %c0_3 = arith.constant 0 : index
    %3 = vector.load %arg0[%c0_2, %c0_3] : memref<32x64xbf16, #tpu.memory_space<vmem>>, vector<32x64xbf16>
    %cst = arith.constant dense<0.000000e+00> : vector<32x128xf32>
    %4 = tpu.matmul %3, %0, %cst {dimension_numbers = #tpu.dot_dimension_numbers<[1], [0], [0], [1], [0, 0, 1, 1], [], []>} : vector<32x64xbf16>, vector<64x128xbf16>, vector<32x128xf32> -> vector<32x128xf32>
    %c0_4 = arith.constant 0 : index
    %c0_5 = arith.constant 0 : index
    %5 = vector.load %arg3[%c0_4, %c0_5] : memref<32x1xf32, #tpu.memory_space<vmem>>, vector<32x1xf32>
    %6 = vector.broadcast %5 : vector<32x1xf32> to vector<32x128xf32>
    %7 = arith.mulf %4, %6 : vector<32x128xf32>
    %8 = arith.truncf %7 : vector<32x128xf32> to vector<32x128xbf16>
    %c0_6 = arith.constant 0 : index
    %c0_7 = arith.constant 0 : index
    %9 = vector.load %arg14[%c0_6, %c0_7] : memref<32x256xbf16, #tpu.memory_space<vmem>>, vector<32x128xbf16>
    tpu.vector_store %arg14[%c0_6, %c0_7], %8 {strides = array<i32>} : memref<32x256xbf16, #tpu.memory_space<vmem>>, vector<32x128xbf16>,
    %c0_8 = arith.constant 0 : index
    %c0_9 = arith.constant 0 : index
    %10 = vector.load %arg14[%c0_8, %c0_9] : memref<32x256xbf16, #tpu.memory_space<vmem>>, vector<32x256xbf16>
    %c0_10 = arith.constant 0 : index
    %c0_11 = arith.constant 0 : index
    %11 = vector.load %arg7[%c0_10, %c0_11] : memref<256x128xbf16, #tpu.memory_space<vmem>>, vector<256x128xbf16>
    %cst_12 = arith.constant dense<0.000000e+00> : vector<32x128xf32>
    %12 = tpu.matmul %10, %11, %cst_12 {dimension_numbers = #tpu.dot_dimension_numbers<[1], [0], [0], [1], [0, 0, 1, 1], [], []>} : vector<32x256xbf16>, vector<256x128xbf16>, vector<32x128xf32> -> vector<32x128xf32>
    %c0_13 = arith.constant 0 : index
    %c0_14 = arith.constant 0 : index
    %13 = vector.load %arg10[%c0_13, %c0_14] : memref<1x128xf32, #tpu.memory_space<vmem>>, vector<1x128xf32>
    %14 = vector.broadcast %13 : vector<1x128xf32> to vector<32x128xf32>
    %15 = arith.addf %12, %14 : vector<32x128xf32>
    %cst_15 = arith.constant 0.000000e+00 : f32
    %16 = vector.broadcast %cst_15 : f32 to vector<32x128xf32>
    %17 = arith.maximumf %15, %16 : vector<32x128xf32>
    %18 = arith.truncf %17 : vector<32x128xf32> to vector<32x128xbf16>
    %c0_16 = arith.constant 0 : index
    %c128_17 = arith.constant 128 : index
    %19 = vector.load %arg15[%c0_16, %c128_17] : memref<32x256xbf16, #tpu.memory_space<vmem>>, vector<32x128xbf16>
    tpu.vector_store %arg15[%c0_16, %c128_17], %18 {strides = array<i32>} : memref<32x256xbf16, #tpu.memory_space<vmem>>, vector<32x128xbf16>,
    %c0_18 = arith.constant 0 : index
    %c128_19 = arith.constant 128 : index
    %20 = vector.load %arg15[%c0_18, %c128_19] : memref<32x256xbf16, #tpu.memory_space<vmem>>, vector<32x128xbf16>
    %c0_20 = arith.constant 0 : index
    %c0_21 = arith.constant 0 : index
    %21 = vector.load %arg1[%c0_20, %c0_21] : memref<16x32xbf16, #tpu.memory_space<vmem>>, vector<16x32xbf16>
    %cst_22 = arith.constant dense<0.000000e+00> : vector<16x128xf32>
    %22 = tpu.matmul %21, %20, %cst_22 {dimension_numbers = #tpu.dot_dimension_numbers<[1], [0], [0], [1], [0, 0, 1, 1], [], []>} : vector<16x32xbf16>, vector<32x128xbf16>, vector<16x128xf32> -> vector<16x128xf32>
    %c0_23 = arith.constant 0 : index
    %c0_24 = arith.constant 0 : index
    %23 = vector.load %arg4[%c0_23, %c0_24] : memref<16x1xf32, #tpu.memory_space<vmem>>, vector<16x1xf32>
    %24 = vector.broadcast %23 : vector<16x1xf32> to vector<16x128xf32>
    %25 = arith.mulf %22, %24 : vector<16x128xf32>
    %26 = arith.truncf %25 : vector<16x128xf32> to vector<16x128xbf16>
    %c0_25 = arith.constant 0 : index
    %c0_26 = arith.constant 0 : index
    %27 = vector.load %arg15[%c0_25, %c0_26] : memref<32x256xbf16, #tpu.memory_space<vmem>>, vector<16x128xbf16>
    tpu.vector_store %arg15[%c0_25, %c0_26], %26 {strides = array<i32>} : memref<32x256xbf16, #tpu.memory_space<vmem>>, vector<16x128xbf16>,
    %c0_27 = arith.constant 0 : index
    %c0_28 = arith.constant 0 : index
    %28 = vector.load %arg15[%c0_27, %c0_28] : memref<32x256xbf16, #tpu.memory_space<vmem>>, vector<16x256xbf16>
    %c0_29 = arith.constant 0 : index
    %c0_30 = arith.constant 0 : index
    %29 = vector.load %arg8[%c0_29, %c0_30] : memref<256x128xbf16, #tpu.memory_space<vmem>>, vector<256x128xbf16>
    %cst_31 = arith.constant dense<0.000000e+00> : vector<16x128xf32>
    %30 = tpu.matmul %28, %29, %cst_31 {dimension_numbers = #tpu.dot_dimension_numbers<[1], [0], [0], [1], [0, 0, 1, 1], [], []>} : vector<16x256xbf16>, vector<256x128xbf16>, vector<16x128xf32> -> vector<16x128xf32>
    %c0_32 = arith.constant 0 : index
    %c0_33 = arith.constant 0 : index
    %31 = vector.load %arg11[%c0_32, %c0_33] : memref<1x128xf32, #tpu.memory_space<vmem>>, vector<1x128xf32>
    %32 = vector.broadcast %31 : vector<1x128xf32> to vector<16x128xf32>
    %33 = arith.addf %30, %32 : vector<16x128xf32>
    %cst_34 = arith.constant 0.000000e+00 : f32
    %34 = vector.broadcast %cst_34 : f32 to vector<16x128xf32>
    %35 = arith.maximumf %33, %34 : vector<16x128xf32>
    %36 = arith.truncf %35 : vector<16x128xf32> to vector<16x128xbf16>
    %c0_35 = arith.constant 0 : index
    %c128_36 = arith.constant 128 : index
    %37 = vector.load %arg14[%c0_35, %c128_36] : memref<32x256xbf16, #tpu.memory_space<vmem>>, vector<16x128xbf16>
    tpu.vector_store %arg14[%c0_35, %c128_36], %36 {strides = array<i32>} : memref<32x256xbf16, #tpu.memory_space<vmem>>, vector<16x128xbf16>,
    %c0_37 = arith.constant 0 : index
    %c128_38 = arith.constant 128 : index
    %38 = vector.load %arg14[%c0_37, %c128_38] : memref<32x256xbf16, #tpu.memory_space<vmem>>, vector<16x128xbf16>
    %c0_39 = arith.constant 0 : index
    %c0_40 = arith.constant 0 : index
    %39 = vector.load %arg2[%c0_39, %c0_40] : memref<16x16xbf16, #tpu.memory_space<vmem>>, vector<16x16xbf16>
    %cst_41 = arith.constant dense<0.000000e+00> : vector<16x128xf32>
    %40 = tpu.matmul %39, %38, %cst_41 {dimension_numbers = #tpu.dot_dimension_numbers<[1], [0], [0], [1], [0, 0, 1, 1], [], []>} : vector<16x16xbf16>, vector<16x128xbf16>, vector<16x128xf32> -> vector<16x128xf32>
    %c0_42 = arith.constant 0 : index
    %c0_43 = arith.constant 0 : index
    %41 = vector.load %arg5[%c0_42, %c0_43] : memref<16x1xf32, #tpu.memory_space<vmem>>, vector<16x1xf32>
    %42 = vector.broadcast %41 : vector<16x1xf32> to vector<16x128xf32>
    %43 = arith.mulf %40, %42 : vector<16x128xf32>
    %44 = arith.truncf %43 : vector<16x128xf32> to vector<16x128xbf16>
    %c0_44 = arith.constant 0 : index
    %c0_45 = arith.constant 0 : index
    %45 = vector.load %arg14[%c0_44, %c0_45] : memref<32x256xbf16, #tpu.memory_space<vmem>>, vector<16x128xbf16>
    tpu.vector_store %arg14[%c0_44, %c0_45], %44 {strides = array<i32>} : memref<32x256xbf16, #tpu.memory_space<vmem>>, vector<16x128xbf16>,
    %c0_46 = arith.constant 0 : index
    %c0_47 = arith.constant 0 : index
    %46 = vector.load %arg14[%c0_46, %c0_47] : memref<32x256xbf16, #tpu.memory_space<vmem>>, vector<16x256xbf16>
    %c0_48 = arith.constant 0 : index
    %c0_49 = arith.constant 0 : index
    %47 = vector.load %arg9[%c0_48, %c0_49] : memref<256x128xbf16, #tpu.memory_space<vmem>>, vector<256x128xbf16>
    %cst_50 = arith.constant dense<0.000000e+00> : vector<16x128xf32>
    %48 = tpu.matmul %46, %47, %cst_50 {dimension_numbers = #tpu.dot_dimension_numbers<[1], [0], [0], [1], [0, 0, 1, 1], [], []>} : vector<16x256xbf16>, vector<256x128xbf16>, vector<16x128xf32> -> vector<16x128xf32>
    %c0_51 = arith.constant 0 : index
    %c0_52 = arith.constant 0 : index
    %49 = vector.load %arg12[%c0_51, %c0_52] : memref<1x128xf32, #tpu.memory_space<vmem>>, vector<1x128xf32>
    %50 = vector.broadcast %49 : vector<1x128xf32> to vector<16x128xf32>
    %51 = arith.addf %48, %50 : vector<16x128xf32>
    %52 = tpu.iota {dimensions = array<i32: 1>} : vector<16x128xi32>
    %c8_i32 = arith.constant 8 : i32
    %53 = vector.broadcast %c8_i32 : i32 to vector<16x128xi32>
    %54 = arith.cmpi slt, %52, %53 : vector<16x128xi32>
    %cst_53 = arith.constant 0xFF800000 : f32
    %55 = vector.broadcast %cst_53 : f32 to vector<16x128xf32>
    %56 = arith.select %54, %51, %55 : vector<16x128xi1>, vector<16x128xf32>
    %cst_54 = arith.constant dense<0xFF800000> : vector<16xf32>
    %57 = vector.multi_reduction <maximumf>, %56, %cst_54 [1] : vector<16x128xf32> to vector<16xf32>
    %58 = vector.shape_cast %57 : vector<16xf32> to vector<16x1xf32>
    %59 = vector.broadcast %58 : vector<16x1xf32> to vector<16x128xf32>
    %60 = arith.subf %56, %59 : vector<16x128xf32>
    %61 = math.exp %60 : vector<16x128xf32>
    %cst_55 = arith.constant 0.000000e+00 : f32
    %62 = vector.broadcast %cst_55 : f32 to vector<16x128xf32>
    %63 = arith.select %54, %61, %62 : vector<16x128xi1>, vector<16x128xf32>
    %cst_56 = arith.constant dense<0.000000e+00> : vector<16xf32>
    %64 = vector.multi_reduction <add>, %63, %cst_56 [1] : vector<16x128xf32> to vector<16xf32>
    %65 = vector.shape_cast %64 : vector<16xf32> to vector<16x1xf32>
    %66 = math.log %65 : vector<16x1xf32>
    %67 = vector.broadcast %66 : vector<16x1xf32> to vector<16x128xf32>
    %68 = arith.subf %60, %67 : vector<16x128xf32>
    %cst_57 = arith.constant 0.000000e+00 : f32
    %69 = vector.broadcast %cst_57 : f32 to vector<16x128xf32>
    %70 = arith.select %54, %68, %69 : vector<16x128xi1>, vector<16x128xf32>
    %c0_58 = arith.constant 0 : index
    %c0_59 = arith.constant 0 : index
    %71 = vector.load %arg13[%c0_58, %c0_59] : memref<16x128xf32, #tpu.memory_space<vmem>>, vector<16x128xf32>
    tpu.vector_store %arg13[%c0_58, %c0_59], %70 {strides = array<i32>} : memref<16x128xf32, #tpu.memory_space<vmem>>, vector<16x128xf32>,
    return
  }
}

</mosaic_0001>

<bundles_post_ra>
// kernel: tpu_custom_call.1
= control target key start
LH: loop header
LB: loop body
LE: loop exit
PB: predicated region body
PF: predicated region fallthrough
CT: control target
= control target key end

     0   :  { %18 = vsyncpa [#allocation5], 0  ;;  %s1552_s0 = inlined_call_operand.vmem [shape: bf16[32,64], index: 0, kind: input, shape index: {}]   ;;  %s1553_s1 = inlined_call_operand.vmem [shape: bf16[16,32], index: 1, kind: input, shape index: {}]   ;;  %s1554_s2 = inlined_call_operand.vmem [shape: bf16[16,16], index: 2, kind: input, shape index: {}]   ;;  %s1555_s3 = inlined_call_operand.vmem [shape: f32[32,1], index: 3, kind: input, shape index: {}]   ;;  %s1556_s4 = inlined_call_operand.vmem [shape: f32[16,1], index: 4, kind: input, shape index: {}]   ;;  %s1557_s5 = inlined_call_operand.vmem [shape: f32[16,1], index: 5, kind: input, shape index: {}]   ;;  %s1558_s6 = inlined_call_operand.vmem [shape: bf16[64,128], index: 6, kind: input, shape index: {}]   ;;  %s1559_s7 = inlined_call_operand.hbm [shape: bf16[256,128], index: 7, kind: input, shape index: {}]   ;;  %s1560_s8 = inlined_call_operand.hbm [shape: bf16[256,128], index: 8, kind: input, shape index: {}]   ;;  %s1561_s9 = inlined_call_operand.hbm [shape: bf16[256,128], index: 9, kind: input, shape index: {}]   ;;  %s1562_s10 = inlined_call_operand.vmem [shape: f32[1,128], index: 10, kind: input, shape index: {}]   ;;  %s1563_s11 = inlined_call_operand.vmem [shape: f32[1,128], index: 11, kind: input, shape index: {}]   ;;  %s1564_s12 = inlined_call_operand.vmem [shape: f32[1,128], index: 12, kind: input, shape index: {}]   ;;  %s1565_s13 = inlined_call_operand.hbm [shape: f32[16,128], index: 13, kind: output, shape index: {}]  }
   0x1   :  { %19 = vsyncpa [#allocation8], 0 }
   0x2   :  { %20 = vsyncpa [#allocation6], 0  ;;  %s52_s27 = sshll.u32 %s1560_s8, 4  ;;  %s1386_s28 = smov [#allocation7]   ;;  %s53_s27 = int_to_ptr.hbm [resolvable:$true] %s52_s27 }
   0x3   :  { %s54_s29 = sshll.u32 %s1386_s28, 4  ;;  %s39_s15 = sshll.u32 %s1559_s7, 4  ;;  %s55_s29 = int_to_ptr.vmem [resolvable:$true] %s54_s29  ;;  %s40_s15 = int_to_ptr.hbm [resolvable:$true] %s39_s15 }
   0x4   :  { %s1387_s16 = smov 64   ;;  %s1388_s17 = smov 4  }
   0x5   :  { %60 = dma.hbm_to_vmem [thread:$0]  %s53_s27, 2048, %s55_s29, [#allocation8], %s1387_s16, %s1387_s16, %s1388_s17  }
   0x6   :  { %s1389_s18 = smov [#allocation4]   ;;  %s65_s22 = sshll.u32 %s1561_s9, 4  ;;  %s66_s22 = int_to_ptr.hbm [resolvable:$true] %s65_s22 }
   0x7   :  { %s41_s19 = sshll.u32 %s1389_s18, 4  ;;  %s1390_s8 = smov [#allocation9]   ;;  %s42_s19 = int_to_ptr.vmem [resolvable:$true] %s41_s19 }
   0x8   :  { %47 = dma.hbm_to_vmem [thread:$0]  %s40_s15, 2048, %s42_s19, [#allocation5], %s1387_s16, %s1387_s16, %s1388_s17  }
   0x9   :  { %s67_s23 = sshll.u32 %s1390_s8, 4  ;;  %s68_s23 = int_to_ptr.vmem [resolvable:$true] %s67_s23 }
   0xa   :  { %73 = dma.hbm_to_vmem [thread:$0]  %s66_s22, 2048, %s68_s23, [#allocation8], %s1387_s16, %s1387_s16, %s1388_s17  }
   0xb   :  { %1380 = dma.done.wait [#allocation5], 2048  }
   0xc   :  { %1381 = vsyncadd [#allocation5], 4294965248 }
   0xd   :  { %1382 = dma.done.wait [#allocation8], 4096  }
   0xe   :  { %1383 = vsyncadd [#allocation8], 4294963200  ;;  %v1391_v0 = vmov 0   ;;  %v1197_v1 = vld [vmem:[%s1558_s6 + $0x18] sm:$0xff]  ;;  %v169_v2 = vld [vmem:[%s1555_s3] sm:$0xff]  ;;  %vm143_vm0 = vcmask 523264  }
   0xf   :  { %1270 = vset.pattern.permute.xlu0 %v1391_v0  ;;  %1271 = vset.pattern.permute.xlu1 %v1391_v0  ;;  %v1196_v3 = vld [vmem:[%s1558_s6 + $0x10] sm:$0xff]  ;;  %v1219_v5 = vld [vmem:[#allocation4 + $0x78] sm:$0xff]  ;;  %v1195_v6 = vld [vmem:[%s1558_s6 + $0x8] sm:$0xff]  ;;  %vm434_vm1 = vcmask 261120   ;;  %vm663_vm2 = vcmask 130048   ;;  %s908_s7 = sshll.u32 %s1565_s13, 4  ;;  %s909_s7 = int_to_ptr.hbm [resolvable:$true] %s908_s7 }
  0x10   :  { %1272 = vset.pattern.permute.xlu2 %v1391_v0  ;;  %154 = vmatpush.bf16.msra.mxu0 %v1197_v1  ;;  %v171_v4 = vld [vmem:[%s1555_s3 + $0x10] sm:$0xff]  ;;  %v170_v7 = vld [vmem:[%s1555_s3 + $0x8] sm:$0xff]  ;;  %v172_v9 = vld [vmem:[%s1555_s3 + $0x18] sm:$0xff]  ;;  %s1393_s3 = smov 128   ;;  %s1394_s24 = smov 8  }
  0x11   :  { %175 = vperm.xlu0 %1270, %v169_v2   ;;  %185 = vperm.xlu1 %1271, %v171_v4   ;;  %v1218_v8 = vld [vmem:[#allocation4 + $0x70] sm:$0xff]  ;;  %v1194_v10 = vld [vmem:[%s1558_s6] sm:$0xff]  ;;  %v682_v13 = vld [vmem:[%s1557_s5 + $0x8] sm:$0xff] }
  0x12   :  { %380 = vmatpush.bf16.msra.mxu2 %v1219_v5  ;;  %v1198_v11 = vld [vmem:[%s1552_s0] sm:$0xff]  ;;  %v1199_v14 = vld [vmem:[%s1552_s0 + $0x8] sm:$0xff]  ;;  %v1211_v16 = vld [vmem:[#allocation4 + $0x38] sm:$0xff] }
  0x13   :  { %v681_v12 = vld [vmem:[%s1557_s5] sm:$0xff]  ;;  %v1217_v15 = vld [vmem:[#allocation4 + $0x68] sm:$0xff]  ;;  %361 = vmatpush.bf16.msra.mxu1 %v1211_v16  ;;  %v1210_v18 = vld [vmem:[#allocation4 + $0x30] sm:$0xff] }
  0x14   :  { %155 = vmatpush.bf16.msra.mxu0 %v1196_v3  ;;  %v1216_v17 = vld [vmem:[#allocation4 + $0x60] sm:$0xff]  ;;  %v1215_v19 = vld [vmem:[#allocation4 + $0x58] sm:$0xff]  ;;  %v1209_v20 = vld [vmem:[#allocation4 + $0x28] sm:$0xff] }
  0x15   :  { %v1214_v21 = vld [vmem:[#allocation4 + $0x50] sm:$0xff]  ;;  %v93_v22 = vld [vmem:[%s1558_s6] sm:$0xf]  ;;  %v94_v23 = vld [vmem:[%s1558_s6 + $0x4] sm:$0xf] }
  0x16   :  { %381 = vmatpush.bf16.msra.mxu2 %v1218_v8  ;;  %101 = vst [vmem:[#allocation2 + $0x4] sm:$0xf] %v93_v22  ;;  %v1208_v24 = vld [vmem:[#allocation4 + $0x20] sm:$0xff]  ;;  %v1213_v25 = vld [vmem:[#allocation4 + $0x48] sm:$0xff]  ;;  %v1207_v26 = vld [vmem:[#allocation4 + $0x18] sm:$0xff] }
  0x17   :  { %362 = vmatpush.bf16.msra.mxu1 %v1210_v18  ;;  %102 = vst [vmem:[#allocation2 + $0xc] sm:$0xf] %v94_v23  ;;  %v1212_v27 = vld [vmem:[#allocation4 + $0x40] sm:$0xff]  ;;  %v1206_v31 = vld [vmem:[#allocation4 + $0x10] sm:$0xff]  ;;  %v1205_v32 = vld [vmem:[#allocation4 + $0x8] sm:$0xff] }
  0x18   :  { %156 = vmatpush.bf16.msra.mxu0 %v1195_v6  ;;  %v95_v33 = vld [vmem:[%s1558_s6 + $0x8] sm:$0xf]  ;;  %v96_v34 = vld [vmem:[%s1558_s6 + $0xc] sm:$0xf]  ;;  %v1204_v35 = vld [vmem:[#allocation4] sm:$0xff] }
  0x19   :  { %180 = vperm.xlu0 %1270, %v170_v7   ;;  %190 = vperm.xlu1 %1271, %v172_v9   ;;  %103 = vst [vmem:[#allocation2 + $0x14] sm:$0xf] %v95_v33  ;;  %v1240_v61 = vld [vmem:[#allocation7 + $0x78] sm:$0xff]  ;;  %v1239_v62 = vld [vmem:[#allocation7 + $0x70] sm:$0xff]  ;;  %v1238_v63 = vld [vmem:[#allocation7 + $0x68] sm:$0xff] }
  0x1a   :  { %382 = vmatpush.bf16.msra.mxu2 %v1217_v15  ;;  %104 = vst [vmem:[#allocation2 + $0x1c] sm:$0xf] %v96_v34  ;;  %v1237_v0 = vld [vmem:[#allocation7 + $0x60] sm:$0xff]  ;;  %v1236_v1 = vld [vmem:[#allocation7 + $0x58] sm:$0xff]  ;;  %v1235_v2 = vld [vmem:[#allocation7 + $0x50] sm:$0xff] }
  0x1b   :  { %363 = vmatpush.bf16.msra.mxu1 %v1209_v20  ;;  %v1234_v3 = vld [vmem:[#allocation7 + $0x48] sm:$0xff]  ;;  %v1233_v4 = vld [vmem:[#allocation7 + $0x40] sm:$0xff] }
  0x1c   :  { %157 = vmatpush.bf16.msra.mxu0 %v1194_v10  ;;  %v1273_v6 = vld [vmem:[%s1562_s10] ss:$0 sm:$0xff] }
  0x1d   :  { %v1200_v28 = vld [vmem:[#allocation2 + $0x4] sm:$0xf] }
  0x1e   :  { %383 = vmatpush.bf16.msra.mxu2 %v1216_v17  ;;  %v952_v29 = vld [vmem:[#allocation2 + $0x8] sm:$0xf0] }
  0x1f   :  { %946 = vmatmul.msk.bf16.vlgmr.msra.gmra.mxu0 %vm143_vm0, %v1198_v11  ;;  %364 = vmatpush.bf16.msra.mxu1 %v1208_v24  ;;  %v955_v30 = vor.u32 %v1200_v28, %v952_v29  ;;  %v453_v28 = vld [vmem:[%s1556_s4 + $0x8] sm:$0xff] }
  0x20   :  { %v1202_v36 = vld [vmem:[#allocation2 + $0x14] sm:$0xf]  ;;  %628 = vmatpush.bf16.msrb.mxu0 %v1240_v61 }
  0x21   :  { %685 = vperm.xlu0 %1270, %v681_v12   ;;  %690 = vperm.xlu1 %1271, %v682_v13   ;;  %v960_v37 = vld [vmem:[#allocation2 + $0x18] sm:$0xf0] }
  0x22   :  { %384 = vmatpush.bf16.msra.mxu2 %v1215_v19  ;;  %v963_v38 = vor.u32 %v1202_v36, %v960_v37 }
  0x23   :  { %365 = vmatpush.bf16.msra.mxu1 %v1207_v26 }
  0x24   :  { %629 = vmatpush.bf16.msrb.mxu0 %v1239_v62  ;;  %v1259_v62 = vld [vmem:[#allocation9 + $0x70] sm:$0xff] }
  0x26   :  { %385 = vmatpush.bf16.msra.mxu2 %v1214_v21  ;;  %v452_v21 = vld [vmem:[%s1556_s4] sm:$0xff] }
  0x27   :  { %366 = vmatpush.bf16.msra.mxu1 %v1206_v31  ;;  %456 = vperm.xlu2 %1272, %v452_v21  }
  0x28   :  { %630 = vmatpush.bf16.msrb.mxu0 %v1238_v63  ;;  %v1258_v63 = vld [vmem:[#allocation9 + $0x68] sm:$0xff] }
  0x2a   :  { %386 = vmatpush.bf16.msra.mxu2 %v1213_v25 }
  0x2b   :  { %367 = vmatpush.bf16.msra.mxu1 %v1205_v32 }
  0x2c   :  { %631 = vmatpush.bf16.msrb.mxu0 %v1237_v0  ;;  %v1257_v0 = vld [vmem:[#allocation9 + $0x60] sm:$0xff] }
  0x2e   :  { %387 = vmatpush.bf16.msra.mxu2 %v1212_v27 }
  0x2f   :  { %947 = vmatmul.msk.bf16.gmra.mxu0 %vm143_vm0, %v1199_v14  ;;  %368 = vmatpush.bf16.msra.mxu1 %v1204_v35 }
  0x30   :  { %632 = vmatpush.bf16.msrb.mxu0 %v1236_v1  ;;  %461 = vperm.xlu2 %1272, %v453_v28   ;;  %v1256_v1 = vld [vmem:[#allocation9 + $0x58] sm:$0xff]  ;;  %v1249_v28 = vld [vmem:[#allocation9 + $0x20] sm:$0xff] }
  0x31   :  { %388 = vmatmul.bf16.vlgmr.msra.gmra.mxu2 %v955_v30 }
  0x34   :  { %633 = vmatpush.bf16.msrb.mxu0 %v1235_v2  ;;  %v1255_v2 = vld [vmem:[#allocation9 + $0x50] sm:$0xff] }
  0x38   :  { %634 = vmatpush.bf16.msrb.mxu0 %v1234_v3  ;;  %v1254_v3 = vld [vmem:[#allocation9 + $0x48] sm:$0xff] }
  0x3c   :  { %635 = vmatpush.bf16.msrb.mxu0 %v1233_v4  ;;  %v1253_v4 = vld [vmem:[#allocation9 + $0x40] sm:$0xff] }
  0x41   :  { %393 = vmatmul.bf16.gmra.mxu2 %v963_v38 }
  0x83   :  { %v176_v39 = vpop.permute.xlu0 %175  ;;  %v186_v47 = vpop.permute.xlu1 %185 }
  0x8b   :  { %v181_v43 = vpop.permute.xlu0 %180  ;;  %v191_v54 = vpop.permute.xlu1 %190 }
  0x9c   :  { %v159_v40 = vpop.f32.mrf.mxu0 }
  0x9d   :  { %v193_v41 = vmul.f32 %v176_v39, %v159_v40 }
  0x9f   :  { %v197_v42 = vpack.c.bf16 %v193_v41, %v193_v41  ;;  %v1222_v41 = vld [vmem:[%s1553_s1] sm:$0xff] }
  0xa1   :  { %201 = vst [vmem:[#allocation2] sm:$0xf] %v197_v42  ;;  %v1232_v42 = vld [vmem:[#allocation7 + $0x38] sm:$0xff] }
  0xa4   :  { %v161_v44 = vpop.f32.mrf.mxu0 }
  0xa5   :  { %v194_v45 = vmul.f32 %v181_v43, %v161_v44  ;;  %v1231_v43 = vld [vmem:[#allocation7 + $0x30] sm:$0xff]  ;;  %v1230_v44 = vld [vmem:[#allocation7 + $0x28] sm:$0xff] }
  0xa7   :  { %v198_v46 = vpack.c.bf16 %v194_v45, %v194_v45  ;;  %v1229_v45 = vld [vmem:[#allocation7 + $0x20] sm:$0xff] }
  0xa8   :  { %v950_v51 = vld [vmem:[#allocation2] sm:$0xf] }
  0xa9   :  { %202 = vst [vmem:[#allocation2 + $0x8] sm:$0xf] %v198_v46  ;;  %v1228_v46 = vld [vmem:[#allocation7 + $0x18] sm:$0xff] }
  0xac   :  { %v164_v48 = vpop.f32.mrf.mxu0 }
  0xad   :  { %v195_v49 = vmul.f32 %v186_v47, %v164_v48  ;;  %v1227_v47 = vld [vmem:[#allocation7 + $0x10] sm:$0xff]  ;;  %v1226_v48 = vld [vmem:[#allocation7 + $0x8] sm:$0xff] }
  0xaf   :  { %v199_v50 = vpack.c.bf16 %v195_v49, %v195_v49  ;;  %v1225_v49 = vld [vmem:[#allocation7] sm:$0xff] }
  0xb0   :  { %v1201_v52 = vld [vmem:[#allocation2 + $0x4] sm:$0xf0] }
  0xb1   :  { %203 = vst [vmem:[#allocation2 + $0x10] sm:$0xf] %v199_v50  ;;  %v951_v53 = vor.u32 %v1201_v52, %v950_v51  ;;  %v1260_v50 = vld [vmem:[#allocation9 + $0x78] sm:$0xff]  ;;  %v457_v51 = vpop.permute.xlu2 %456 }
  0xb2   :  { %857 = vmatpush.bf16.msrb.mxu2 %v1260_v50 }
  0xb3   :  { %369 = vmatmul.bf16.vlgmr.msra.gmra.mxu1 %v951_v53 }
  0xb4   :  { %v166_v55 = vpop.f32.mrf.mxu0  ;;  %v389_v5 = vpop.f32.mrf.mxu2 }
  0xb5   :  { %v196_v56 = vmul.f32 %v191_v54, %v166_v55 }
  0xb6   :  { %858 = vmatpush.bf16.msrb.mxu2 %v1259_v62 }
  0xb7   :  { %v200_v57 = vpack.c.bf16 %v196_v56, %v196_v56 }
  0xb8   :  { %v958_v58 = vld [vmem:[#allocation2 + $0x10] sm:$0xf] }
  0xb9   :  { %204 = vst [vmem:[#allocation2 + $0x18] sm:$0xf] %v200_v57  ;;  %v462_v55 = vpop.permute.xlu2 %461 }
  0xba   :  { %859 = vmatpush.bf16.msrb.mxu2 %v1258_v63 }
  0xbc   :  { %v391_v11 = vpop.f32.mrf.mxu2 }
  0xbe   :  { %860 = vmatpush.bf16.msrb.mxu2 %v1257_v0 }
  0xc0   :  { %v1203_v59 = vld [vmem:[#allocation2 + $0x14] sm:$0xf0] }
  0xc1   :  { %v959_v60 = vor.u32 %v1203_v59, %v958_v58 }
  0xc2   :  { %861 = vmatpush.bf16.msrb.mxu2 %v1256_v1 }
  0xc3   :  { %374 = vmatmul.bf16.gmra.mxu1 %v959_v60 }
  0xc4   :  { %v394_v18 = vpop.f32.mrf.mxu2 }
  0xc6   :  { %862 = vmatpush.bf16.msrb.mxu2 %v1255_v2 }
  0xca   :  { %863 = vmatpush.bf16.msrb.mxu2 %v1254_v3 }
  0xcc   :  { %v396_v31 = vpop.f32.mrf.mxu2 }
  0xce   :  { %864 = vmatpush.bf16.msrb.mxu2 %v1253_v4 }
 0x130   :  { %v370_v7 = vpop.f32.mrf.mxu1 }
 0x131   :  { %v371_v8 = vadd.f32 %v1273_v6, %v370_v7 }
 0x133   :  { %v390_v9 = vadd.f32 %v389_v5, %v371_v8  ;;  %v1274_v5 = vld [vmem:[%s1563_s11] ss:$0 sm:$0xff] }
 0x135   :  { %v399_v10 = vmax.f32 %v390_v9, 0.0  ;;  %v1251_v9 = vld [vmem:[#allocation9 + $0x30] sm:$0xff] }
 0x137   :  { %v403_v12 = vpack.c.bf16 %v399_v10, %v399_v10 }
 0x138   :  { %v372_v13 = vpop.f32.mrf.mxu1 }
 0x139   :  { %407 = vst [vmem:[#allocation3 + $0x4] sm:$0xf] %v403_v12  ;;  %v373_v14 = vadd.f32 %v1273_v6, %v372_v13 }
 0x13b   :  { %v392_v15 = vadd.f32 %v391_v11, %v373_v14 }
 0x13d   :  { %v400_v16 = vmax.f32 %v392_v15, 0.0 }
 0x13f   :  { %v404_v17 = vpack.c.bf16 %v400_v16, %v400_v16 }
 0x140   :  { %v375_v19 = vpop.f32.mrf.mxu1  ;;  %v1223_v26 = vld [vmem:[#allocation3 + $0x4] sm:$0xf] }
 0x141   :  { %408 = vst [vmem:[#allocation3 + $0xc] sm:$0xf] %v404_v17  ;;  %v376_v20 = vadd.f32 %v1273_v6, %v375_v19  ;;  %v1034_v39 = vld [vmem:[#allocation3 + $0x4] sm:$0xf] }
 0x143   :  { %v395_v22 = vadd.f32 %v394_v18, %v376_v20 }
 0x145   :  { %v401_v23 = vmax.f32 %v395_v22, 0.0 }
 0x147   :  { %v405_v24 = vpack.c.bf16 %v401_v23, %v401_v23 }
 0x148   :  { %v377_v25 = vpop.f32.mrf.mxu1  ;;  %v1045_v27 = vld [vmem:[#allocation3 + $0x8] sm:$0xf0] }
 0x149   :  { %409 = vst [vmem:[#allocation3 + $0x14] sm:$0xf] %v405_v24  ;;  %v378_v29 = vadd.f32 %v1273_v6, %v377_v25  ;;  %v1048_v30 = vor.u32 %v1223_v26, %v1045_v27  ;;  %v1220_v38 = vld [vmem:[#allocation3 + $0x8] sm:$0xf0]  ;;  %v1252_v6 = vld [vmem:[#allocation9 + $0x38] sm:$0xff]  ;;  %v1242_v26 = vld [vmem:[%s1554_s2] sm:$0xff] }
 0x14a   :  { %v1035_v40 = vor.u32 %v1220_v38, %v1034_v39  ;;  %843 = vmatpush.bf16.msrb.mxu1 %v1252_v6  ;;  %v1250_v27 = vld [vmem:[#allocation9 + $0x28] sm:$0xff] }
 0x14b   :  { %v397_v32 = vadd.f32 %v396_v31, %v378_v29  ;;  %636 = vmatmul.bf16.vlgmr.msrb.gmra.mxu0 %v1048_v30  ;;  %v1248_v29 = vld [vmem:[#allocation9 + $0x18] sm:$0xff]  ;;  %v1247_v30 = vld [vmem:[#allocation9 + $0x10] sm:$0xff]  ;;  %v1246_v31 = vld [vmem:[#allocation9 + $0x8] sm:$0xff] }
 0x14d   :  { %v402_v33 = vmax.f32 %v397_v32, 0.0  ;;  %v1245_v32 = vld [vmem:[#allocation9] sm:$0xff] }
 0x14e   :  { %844 = vmatpush.bf16.msrb.mxu1 %v1251_v9 }
 0x14f   :  { %v406_v34 = vpack.c.bf16 %v402_v33, %v402_v33  ;;  %v686_v33 = vpop.permute.xlu0 %685 }
 0x150   :  { %v1038_v35 = vld [vmem:[#allocation3 + $0x14] sm:$0xf] }
 0x151   :  { %410 = vst [vmem:[#allocation3 + $0x1c] sm:$0xf] %v406_v34 }
 0x152   :  { %845 = vmatpush.bf16.msrb.mxu1 %v1250_v27 }
 0x156   :  { %846 = vmatpush.bf16.msrb.mxu1 %v1249_v28 }
 0x158   :  { %v1221_v36 = vld [vmem:[#allocation3 + $0x18] sm:$0xf0] }
 0x159   :  { %v1039_v37 = vor.u32 %v1221_v36, %v1038_v35 }
 0x15a   :  { %847 = vmatpush.bf16.msrb.mxu1 %v1248_v29 }
 0x15b   :  { %444 = vmatpush.bf16.msra.mxu3 %v1039_v37  ;;  %v691_v37 = vpop.permute.xlu1 %690 }
 0x15e   :  { %848 = vmatpush.bf16.msrb.mxu1 %v1247_v30 }
 0x15f   :  { %445 = vmatpush.bf16.msra.mxu3 %v1035_v40 }
 0x162   :  { %1040 = vmatmul.msk.bf16.vlgmr.msra.gmra.mxu3 %vm434_vm1, %v1222_v41  ;;  %849 = vmatpush.bf16.msrb.mxu1 %v1246_v31 }
 0x163   :  { %614 = vmatpush.bf16.msrb.mxu3 %v1232_v42 }
 0x166   :  { %850 = vmatpush.bf16.msrb.mxu1 %v1245_v32 }
 0x167   :  { %615 = vmatpush.bf16.msrb.mxu3 %v1231_v43 }
 0x16b   :  { %616 = vmatpush.bf16.msrb.mxu3 %v1230_v44  ;;  %v871_v44 = vlaneseq }
 0x16f   :  { %617 = vmatpush.bf16.msrb.mxu3 %v1229_v45  ;;  %v1275_v45 = vld [vmem:[%s1564_s12] ss:$0 sm:$0xff]  ;;  %s1392_s12 = smov [#allocation10]  }
 0x170   :  { %s906_s22 = sshll.u32 %s1392_s12, 4  ;;  %s907_s22 = int_to_ptr.vmem [resolvable:$true] %s906_s22 }
 0x173   :  { %618 = vmatpush.bf16.msrb.mxu3 %v1228_v46  ;;  %v872_v46 = vand.u32 127, %v871_v44 }
 0x175   :  { %vm873_vm3 = vcmp.lt.s32.totalorder %v872_v46, 8 }
 0x177   :  { %619 = vmatpush.bf16.msrb.mxu3 %v1227_v47 }
 0x17b   :  { %620 = vmatpush.bf16.msrb.mxu3 %v1226_v48 }
 0x17f   :  { %621 = vmatpush.bf16.msrb.mxu3 %v1225_v49 }
 0x1c8   :  { %v637_v7 = vpop.f32.mrf.mxu0 }
 0x1d0   :  { %v639_v16 = vpop.f32.mrf.mxu0 }
 0x1e5   :  { %v447_v52 = vpop.f32.mrf.mxu3 }
 0x1e6   :  { %v464_v53 = vmul.f32 %v457_v51, %v447_v52 }
 0x1e8   :  { %v466_v54 = vpack.c.bf16 %v464_v53, %v464_v53 }
 0x1ea   :  { %468 = vst [vmem:[#allocation3] sm:$0xf] %v466_v54 }
 0x1ed   :  { %v449_v56 = vpop.f32.mrf.mxu3 }
 0x1ee   :  { %v465_v57 = vmul.f32 %v462_v55, %v449_v56 }
 0x1f0   :  { %v467_v58 = vpack.c.bf16 %v465_v57, %v465_v57 }
 0x1f1   :  { %v1043_v59 = vld [vmem:[#allocation3] sm:$0xf] }
 0x1f2   :  { %469 = vst [vmem:[#allocation3 + $0x8] sm:$0xf] %v467_v58 }
 0x1f9   :  { %v1224_v60 = vld [vmem:[#allocation3 + $0x4] sm:$0xf0] }
 0x1fa   :  { %v1044_v61 = vor.u32 %v1224_v60, %v1043_v59 }
 0x1fc   :  { %622 = vmatmul.bf16.vlgmr.msrb.gmra.mxu3 %v1044_v61 }
 0x27f   :  { %v623_v8 = vpop.f32.mrf.mxu3 }
 0x280   :  { %v624_v10 = vadd.f32 %v1274_v5, %v623_v8 }
 0x282   :  { %v638_v11 = vadd.f32 %v637_v7, %v624_v10 }
 0x284   :  { %v642_v12 = vmax.f32 %v638_v11, 0.0 }
 0x286   :  { %v644_v13 = vpack.c.bf16 %v642_v12, %v642_v12 }
 0x287   :  { %v625_v14 = vpop.f32.mrf.mxu3 }
 0x288   :  { %646 = vst [vmem:[#allocation2 + $0x4] sm:$0xf] %v644_v13  ;;  %v626_v15 = vadd.f32 %v1274_v5, %v625_v14 }
 0x28a   :  { %v640_v17 = vadd.f32 %v639_v16, %v626_v15 }
 0x28c   :  { %v643_v18 = vmax.f32 %v640_v17, 0.0 }
 0x28e   :  { %v645_v19 = vpack.c.bf16 %v643_v18, %v643_v18 }
 0x28f   :  { %v1119_v20 = vld [vmem:[#allocation2 + $0x4] sm:$0xf] }
 0x290   :  { %647 = vst [vmem:[#allocation2 + $0xc] sm:$0xf] %v645_v19  ;;  %v1243_v22 = vld [vmem:[#allocation2 + $0x4] sm:$0xf] }
 0x297   :  { %v1241_v21 = vld [vmem:[#allocation2 + $0x8] sm:$0xf0] }
 0x298   :  { %v1126_v23 = vld [vmem:[#allocation2 + $0x8] sm:$0xf0]  ;;  %v1120_v24 = vor.u32 %v1241_v21, %v1119_v20 }
 0x299   :  { %v1129_v25 = vor.u32 %v1243_v22, %v1126_v23 }
 0x29a   :  { %674 = vmatpush.bf16.msra.mxu3 %v1120_v24 }
 0x29b   :  { %865 = vmatmul.bf16.vlgmr.msrb.gmra.mxu2 %v1129_v25 }
 0x29d   :  { %1121 = vmatmul.msk.bf16.vlgmr.msra.gmra.mxu3 %vm663_vm2, %v1242_v26 }
 0x31e   :  { %v866_v47 = vpop.f32.mrf.mxu2 }
 0x320   :  { %v676_v34 = vpop.f32.mrf.mxu3 }
 0x321   :  { %v693_v35 = vmul.f32 %v686_v33, %v676_v34 }
 0x323   :  { %v695_v36 = vpack.c.bf16 %v693_v35, %v693_v35 }
 0x325   :  { %697 = vst [vmem:[#allocation2] sm:$0xf] %v695_v36 }
 0x326   :  { %v868_v54 = vpop.f32.mrf.mxu2 }
 0x328   :  { %v678_v38 = vpop.f32.mrf.mxu3 }
 0x329   :  { %v694_v39 = vmul.f32 %v691_v37, %v678_v38 }
 0x32b   :  { %v696_v40 = vpack.c.bf16 %v694_v39, %v694_v39 }
 0x32c   :  { %v1124_v41 = vld [vmem:[#allocation2] sm:$0xf] }
 0x32d   :  { %698 = vst [vmem:[#allocation2 + $0x8] sm:$0xf] %v696_v40 }
 0x334   :  { %v1244_v42 = vld [vmem:[#allocation2 + $0x4] sm:$0xf0] }
 0x335   :  { %v1125_v43 = vor.u32 %v1244_v42, %v1124_v41 }
 0x337   :  { %851 = vmatmul.bf16.vlgmr.msrb.gmra.mxu1 %v1125_v43 }
 0x3b4   :  { %v852_v48 = vpop.f32.mrf.mxu1 }
 0x3b5   :  { %v853_v49 = vadd.f32 %v1275_v45, %v852_v48 }
 0x3b7   :  { %v867_v50 = vadd.f32 %v866_v47, %v853_v49 }
 0x3b9   :  { %v874_v51 = vsel %vm873_vm3, %v867_v50, -inf }
 0x3ba   :  { %876 = vmax.xlane.f32.xlu2 %v874_v51 }
 0x3bc   :  { %v854_v52 = vpop.f32.mrf.mxu1 }
 0x3bd   :  { %v855_v53 = vadd.f32 %v1275_v45, %v854_v52 }
 0x3bf   :  { %v869_v55 = vadd.f32 %v868_v54, %v855_v53 }
 0x3c1   :  { %v875_v56 = vsel %vm873_vm3, %v869_v55, -inf }
 0x3c2   :  { %878 = vmax.xlane.f32.xlu0 %v875_v56 }
 0x42d   :  { %v877_v57 = vpop.xlane.xlu2 %876 }
 0x42e   :  { %v880_v58 = vsub.f32 %v874_v51, %v877_v57 }
 0x430   :  { %v882_v59 = vmul.f32 1.442695, %v880_v58 }
 0x432   :  { %1276 = vpow2.f32 %v882_v59 }
 0x435   :  { %v879_v60 = vpop.xlane.xlu0 %878 }
 0x436   :  { %v881_v61 = vsub.f32 %v875_v56, %v879_v60 }
 0x438   :  { %v1277_v62 = vpop.eup %1276  ;;  %v884_v63 = vmul.f32 1.442695, %v881_v61 }
 0x439   :  { %v886_v0 = vsel %vm873_vm3, %v1277_v62, 0.0 }
 0x43a   :  { %1278 = vpow2.f32 %v884_v63  ;;  %888 = vadd.xlane.f32.xlu1 %v886_v0 }
 0x440   :  { %v1279_v1 = vpop.eup %1278 }
 0x441   :  { %v887_v2 = vsel %vm873_vm3, %v1279_v1, 0.0 }
 0x442   :  { %890 = vadd.xlane.f32.xlu2 %v887_v2 }
 0x4ad   :  { %v889_v3 = vpop.xlane.xlu1 %888 }
 0x4ae   :  { %1280 = vlog2.f32 %v889_v3 }
 0x4b4   :  { %v1281_v4 = vpop.eup %1280 }
 0x4b5   :  { %v893_v5 = vmul.f32 0.6931472, %v1281_v4  ;;  %v891_v6 = vpop.xlane.xlu2 %890 }
 0x4b6   :  { %1282 = vlog2.f32 %v891_v6 }
 0x4b7   :  { %v896_v7 = vsub.f32 %v880_v58, %v893_v5 }
 0x4b9   :  { %v898_v8 = vsel %vm873_vm3, %v896_v7, 0.0 }
 0x4ba   :  { %900 = vst [vmem:[#allocation10] sm:$0xff] %v898_v8 }
 0x4bc   :  { %v1283_v9 = vpop.eup %1282 }
 0x4bd   :  { %v895_v10 = vmul.f32 0.6931472, %v1283_v9 }
 0x4bf   :  { %v897_v11 = vsub.f32 %v881_v61, %v895_v10 }
 0x4c1   :  { %v899_v12 = vsel %vm873_vm3, %v897_v11, 0.0 }
 0x4c2   :  { %901 = vst [vmem:[#allocation10 + $0x8] sm:$0xff] %v899_v12 }
 0x4c3   :  { %914 = dma.vmem_to_hbm [thread:$0]  %s907_s22, 256, %s909_s7, [#allocation6], %s1393_s3, %s1393_s3, %s1394_s24  }
 0x4c4   :  { %1384 = dma.done.wait [#allocation6], 256  }
 0x4c5   :  { %1385 = vsyncadd [#allocation6], 4294967040 }
 0x4c6   :  { %919 = vsyncpa [#allocation5], 1 }
 0x4c7   :  { %920 = vsyncpa [#allocation8], 1 }
 0x4c8   :  { %921 = vsyncpa [#allocation6], 1 }

</bundles_post_ra>
